<compile_context>
chip_gen: v7x
topology: tpu7x:2x2x1
jax: 0.10.0
libtpu: 0.0.40
codegen_flags: <defaults>
</compile_context>

<pallas_src>
import functools

import jax
import jax.numpy as jnp
from jax.experimental import pallas as pl
from jax.experimental.pallas import tpu as pltpu

LANE = 128        # lane width: logits padded to a lane-dense 128-wide output
ROW_ALIGN = 16    # bf16 sublane packing (16 rows per vreg); multiple of 8
SUBLANE = 8       # f32 sublane rows (partial-sum output block height)


def _round_up(x, m):
    return ((x + m - 1) // m) * m


def _device_kind():
    try:
        return jax.devices()[0].device_kind.lower()
    except Exception:  # pragma: no cover - defensive
        return ""


# ----------------------------- fused Pallas kernel -------------------------- #

def _fused_ner_kernel(h_ref, w_ref, b_ref, lm_ref,
                      logits_ref, partial_ref, *, num_labels, ln_eps):
    # h_ref:       (TILE_N, H)  bf16  pre-LayerNorm hidden states (token tile)
    # w_ref:       (H, LP)      bf16  classifier weight, transposed + lane-padded
    # b_ref:       (1, LP)      f32   classifier bias, lane-padded with zeros
    # lm_ref:      (TILE_N, 1)  i32   packed (attention_mask << 16) | label
    # logits_ref:  (TILE_N, LP) bf16  lane-dense logits output
    # partial_ref: (8, LP)      f32   per-tile CE partials: col 0 = num, col 1 = den

    # --- fused LayerNorm prologue: one-pass variance (E[h^2] - mu^2) --------
    # f32 statistics; bf16 only feeds the MXU.
    h = h_ref[...].astype(jnp.float32)
    mu = jnp.mean(h, axis=-1, keepdims=True)
    ms = jnp.mean(h * h, axis=-1, keepdims=True)
    var = jnp.maximum(ms - mu * mu, 0.0)
    x = ((h - mu) * jax.lax.rsqrt(var + ln_eps)).astype(jnp.bfloat16)

    # --- classifier head: lane-dense MXU matmul, f32 accumulate --------------
    logits = jnp.dot(x, w_ref[...], preferred_element_type=jnp.float32) + b_ref[...]
    logits_ref[...] = logits.astype(jnp.bfloat16)   # halve writeback HBM bytes

    # --- masked CrossEntropyLoss(ignore_index=0) partial sums (f32) ----------
    packed = lm_ref[...]                                       # (TILE_N, 1) i32
    labels = jnp.bitwise_and(packed, jnp.int32(0xFFFF))        # low 16 bits
    mask = packed >> 16                                        # high bits (0/1)

    n, lp = logits.shape
    col = jax.lax.broadcasted_iota(jnp.int32, (n, lp), 1)
    in_range = col < num_labels                                # drop lane padding
    neg = jnp.float32(-1e30)

    ml = jnp.where(in_range, logits, neg)
    m = jnp.max(ml, axis=-1, keepdims=True)
    p = jnp.where(in_range, jnp.exp(ml - m), 0.0)
    lse = m + jnp.log(jnp.sum(p, axis=-1, keepdims=True))      # (TILE_N, 1)

    onehot = (col == labels).astype(jnp.float32)               # labels < num_labels
    picked = jnp.sum(logits * onehot, axis=-1, keepdims=True)  # logits[i, label_i]
    nll = lse - picked                                         # (TILE_N, 1)

    # PyTorch semantics: only attention_mask == 1 tokens are selected, and
    # CrossEntropyLoss(ignore_index=0) drops label == 0 tokens; mean over rest.
    valid = jnp.logical_and(mask == 1, labels != 0).astype(jnp.float32)
    num = jnp.sum(nll * valid)
    den = jnp.sum(valid)

    lane_i = jax.lax.broadcasted_iota(jnp.int32, partial_ref.shape, 1)
    partial_ref[...] = jnp.where(lane_i == 0, num,
                                 jnp.where(lane_i == 1, den, 0.0))


# ------------------------------ wrapper ------------------------------------- #

def fused_ner_head(h_flat, w_t_pad, b_pad, packed_lm,
                   *, num_labels, tile_n=None, ln_eps=1e-12):
    """Tiled fused LayerNorm + classifier + masked-CE-partials kernel.

    Tile size / scoped-VMEM limit are chosen per generation:
      * v5e/v6e (128 MiB VMEM, HBM-bound): tile_n=1024 amortizes per-step
        overhead; double-buffered working set stays well under 64 MiB.
      * v7x (64 MiB physical VMEM, 2 TCs): tile_n=512 keeps headroom for the
        compiler-staged f32 LN temporaries under the 32 MiB scoped limit.
    """
    kind = _device_kind()
    is_v7 = "v7" in kind
    if tile_n is None:
        tile_n = 512 if is_v7 else 1024
    vmem_limit = (32 << 20) if is_v7 else (64 << 20)

    n, hdim = h_flat.shape
    lp = w_t_pad.shape[1]

    tile_n = min(tile_n, _round_up(n, ROW_ALIGN))
    tile_n = _round_up(tile_n, ROW_ALIGN)
    n_pad = _round_up(n, tile_n)
    num_tiles = n_pad // tile_n

    if n_pad != n:
        pad = n_pad - n
        h_flat = jnp.pad(h_flat, ((0, pad), (0, 0)))        # zero rows -> LN(0)=0
        packed_lm = jnp.pad(packed_lm, ((0, pad), (0, 0)))  # mask=0, label=0 -> inactive

    kernel = functools.partial(_fused_ner_kernel,
                               num_labels=num_labels, ln_eps=ln_eps)

    logits_pad, partials = pl.pallas_call(
        kernel,
        grid=(num_tiles,),
        in_specs=[
            pl.BlockSpec((tile_n, hdim), lambda i: (i, 0)),   # x tile, pipelined
            pl.BlockSpec((hdim, lp), lambda i: (0, 0)),       # W resident in VMEM
            pl.BlockSpec((1, lp), lambda i: (0, 0)),          # bias resident
            pl.BlockSpec((tile_n, 1), lambda i: (i, 0)),      # packed label|mask tile
        ],
        out_specs=(
            pl.BlockSpec((tile_n, lp), lambda i: (i, 0)),     # lane-dense bf16 logits
            pl.BlockSpec((SUBLANE, lp), lambda i: (i, 0)),    # per-tile partials
        ),
        out_shape=(
            jax.ShapeDtypeStruct((n_pad, lp), jnp.bfloat16),
            jax.ShapeDtypeStruct((num_tiles * SUBLANE, lp), jnp.float32),
        ),
        compiler_params=pltpu.CompilerParams(
            dimension_semantics=("parallel",),                # v7x: 2 TCs split tokens
            vmem_limit_bytes=vmem_limit,
        ),
    )(h_flat, w_t_pad, b_pad, packed_lm)

    return logits_pad, partials, n_pad


def init_params(key, vocab_size, max_seq, hidden, num_labels):
    k0, k1, k2, k3 = jax.random.split(key, 4)
    return {
        # encoder stand-in tables kept in bf16 so the gather+add produces bf16
        # activations directly (no standalone f32->bf16 convert pass over (N,H)).
        "tok_emb": (0.02 * jax.random.normal(k0, (vocab_size, hidden),
                                             jnp.float32)).astype(jnp.bfloat16),
        "pos_emb": (0.02 * jax.random.normal(k1, (max_seq, hidden),
                                             jnp.float32)).astype(jnp.bfloat16),
        # nn.Linear(hidden_size, num_labels): weight (L, H), bias (L,)
        "cls_w": 0.05 * jax.random.normal(k2, (num_labels, hidden), jnp.float32),
        "cls_b": 0.01 * jax.random.normal(k3, (num_labels,), jnp.float32),
    }


def bert_softmax_for_ner_forward(params, input_ids, attention_mask, labels):
    b, s = input_ids.shape
    hdim = params["tok_emb"].shape[1]
    num_labels = params["cls_w"].shape[0]

    # --- BERT encoder stand-in (glue) -------------------------------------- #
    # TODO(synk): replace with a real transformer stack; pretrained weights
    #             cannot be loaded in-script. Final LayerNorm is fused in-kernel.
    h = params["tok_emb"][input_ids] + params["pos_emb"][None, :s, :]  # (B,S,H) bf16

    # dropout: eval-mode identity

    h_flat = h.reshape(b * s, hdim)                                    # bf16, no convert

    # lane-pad the classifier to a 128-wide (lane-dense) output
    lp = max(LANE, _round_up(num_labels, LANE))
    w_t_pad = jnp.zeros((hdim, lp), jnp.bfloat16).at[:, :num_labels].set(
        params["cls_w"].T.astype(jnp.bfloat16))
    b_pad = jnp.zeros((1, lp), jnp.float32).at[0, :num_labels].set(params["cls_b"])

    # pack (attention_mask, label) into one int32 per token: one narrow DMA,
    # half the lane-padded VMEM vs two separate (N,1) arrays.
    packed_lm = ((attention_mask.astype(jnp.int32) << 16)
                 | labels.astype(jnp.int32)).reshape(-1, 1)

    logits_pad, partials, n_pad = fused_ner_head(
        h_flat, w_t_pad, b_pad, packed_lm, num_labels=num_labels)

    # single bf16 slice back to the logical (B, S, L) shape
    logits = logits_pad[:b * s, :num_labels].reshape(b, s, num_labels)

    # final reduction of the per-tile (num, den) partials in JAX
    num_tiles = partials.shape[0] // SUBLANE
    p0 = partials.reshape(num_tiles, SUBLANE, lp)[:, 0, :]
    num_total = jnp.sum(p0[:, 0])
    den_total = jnp.sum(p0[:, 1])
    # NOTE: PyTorch CE over an empty active set returns NaN; we return 0.0.
    loss = num_total / jnp.maximum(den_total, 1.0)
    return loss, logits


# ------------------------------- main ---------------------------------------- #

if __name__ == "__main__":
    B, S, H, L, V = 2, 8, 32, 9, 100   # batch, seq, hidden, num_labels, vocab

    key = jax.random.PRNGKey(0)
    kp, ki, kl = jax.random.split(key, 3)

    params = init_params(kp, vocab_size=V, max_seq=S, hidden=H, num_labels=L)

    input_ids = jax.random.randint(ki, (B, S), 1, V, dtype=jnp.int32)
    labels = jax.random.randint(kl, (B, S), 0, L, dtype=jnp.int32)
    attention_mask = jnp.array(
        [[1, 1, 1, 1, 1, 1, 0, 0],
         [1, 1, 1, 1, 1, 1, 1, 1]], dtype=jnp.int32
    )

    loss, logits = jax.jit(bert_softmax_for_ner_forward)(
        params, input_ids, attention_mask, labels
    )
    jax.block_until_ready((loss, logits))

    assert logits.shape == (B, S, L)
    assert loss.shape == () and bool(jnp.isfinite(loss))
    print("KERNEL_OK")
</pallas_src>

<mosaic_0001>
module attributes {stable_mosaic.version = 11 : i64} {
  func.func @_fused_ner_kernel(%arg0: i32, %arg1: memref<16x32xbf16, #tpu.memory_space<vmem>>, %arg2: memref<32x128xbf16, #tpu.memory_space<vmem>>, %arg3: memref<1x128xf32, #tpu.memory_space<vmem>>, %arg4: memref<16x1xi32, #tpu.memory_space<vmem>>, %arg5: memref<16x128xbf16, #tpu.memory_space<vmem>>, %arg6: memref<8x128xf32, #tpu.memory_space<vmem>>) attributes {dimension_semantics = [#tpu.dimension_semantics<parallel>], iteration_bounds = array<i64: 1>, scalar_prefetch = 0 : i64, scratch_operands = 0 : i64, tpu.core_type = #tpu.core_type<tc>, window_params = [{transform_indices = @transform_0, window_bounds = array<i64: 16, 32>}, {pipeline_mode = #tpu.pipeline_mode<synchronous>, transform_indices = @transform_1, window_bounds = array<i64: 32, 128>}, {pipeline_mode = #tpu.pipeline_mode<synchronous>, transform_indices = @transform_2, window_bounds = array<i64: 1, 128>}, {transform_indices = @transform_3, window_bounds = array<i64: 16, 1>}, {transform_indices = @transform_4, window_bounds = array<i64: 16, 128>}, {transform_indices = @transform_5, window_bounds = array<i64: 8, 128>}]} {
    %c0 = arith.constant 0 : index
    %c0_0 = arith.constant 0 : index
    %0 = vector.load %arg1[%c0, %c0_0] : memref<16x32xbf16, #tpu.memory_space<vmem>>, vector<16x32xbf16>
    %1 = arith.extf %0 : vector<16x32xbf16> to vector<16x32xf32>
    %cst = arith.constant dense<0.000000e+00> : vector<16xf32>
    %2 = vector.multi_reduction <add>, %1, %cst [1] : vector<16x32xf32> to vector<16xf32>
    %3 = vector.shape_cast %2 : vector<16xf32> to vector<16x1xf32>
    %cst_1 = arith.constant 3.200000e+01 : f32
    %4 = vector.broadcast %cst_1 : f32 to vector<16x1xf32>
    %5 = arith.divf %3, %4 : vector<16x1xf32>
    %6 = arith.mulf %1, %1 : vector<16x32xf32>
    %cst_2 = arith.constant dense<0.000000e+00> : vector<16xf32>
    %7 = vector.multi_reduction <add>, %6, %cst_2 [1] : vector<16x32xf32> to vector<16xf32>
    %8 = vector.shape_cast %7 : vector<16xf32> to vector<16x1xf32>
    %cst_3 = arith.constant 3.200000e+01 : f32
    %9 = vector.broadcast %cst_3 : f32 to vector<16x1xf32>
    %10 = arith.divf %8, %9 : vector<16x1xf32>
    %11 = arith.mulf %5, %5 : vector<16x1xf32>
    %12 = arith.subf %10, %11 : vector<16x1xf32>
    %cst_4 = arith.constant 0.000000e+00 : f32
    %13 = vector.broadcast %cst_4 : f32 to vector<16x1xf32>
    %14 = arith.maximumf %12, %13 : vector<16x1xf32>
    %15 = vector.broadcast %5 : vector<16x1xf32> to vector<16x32xf32>
    %16 = arith.subf %1, %15 : vector<16x32xf32>
    %cst_5 = arith.constant 9.99999996E-13 : f32
    %17 = vector.broadcast %cst_5 : f32 to vector<16x1xf32>
    %18 = arith.addf %14, %17 : vector<16x1xf32>
    %19 = math.rsqrt %18 : vector<16x1xf32>
    %20 = vector.broadcast %19 : vector<16x1xf32> to vector<16x32xf32>
    %21 = arith.mulf %16, %20 : vector<16x32xf32>
    %22 = arith.truncf %21 : vector<16x32xf32> to vector<16x32xbf16>
    %c0_6 = arith.constant 0 : index
    %c0_7 = arith.constant 0 : index
    %23 = vector.load %arg2[%c0_6, %c0_7] : memref<32x128xbf16, #tpu.memory_space<vmem>>, vector<32x128xbf16>
    %cst_8 = arith.constant dense<0.000000e+00> : vector<16x128xf32>
    %24 = tpu.matmul %22, %23, %cst_8 {dimension_numbers = #tpu.dot_dimension_numbers<[1], [0], [0], [1], [0, 0, 1, 1], [], []>} : vector<16x32xbf16>, vector<32x128xbf16>, vector<16x128xf32> -> vector<16x128xf32>
    %c0_9 = arith.constant 0 : index
    %c0_10 = arith.constant 0 : index
    %25 = vector.load %arg3[%c0_9, %c0_10] : memref<1x128xf32, #tpu.memory_space<vmem>>, vector<1x128xf32>
    %26 = vector.broadcast %25 : vector<1x128xf32> to vector<16x128xf32>
    %27 = arith.addf %24, %26 : vector<16x128xf32>
    %28 = arith.truncf %27 : vector<16x128xf32> to vector<16x128xbf16>
    %c0_11 = arith.constant 0 : index
    %c0_12 = arith.constant 0 : index
    %29 = vector.load %arg5[%c0_11, %c0_12] : memref<16x128xbf16, #tpu.memory_space<vmem>>, vector<16x128xbf16>
    tpu.vector_store %arg5[%c0_11, %c0_12], %28 {strides = array<i32>} : memref<16x128xbf16, #tpu.memory_space<vmem>>, vector<16x128xbf16>,
    %c0_13 = arith.constant 0 : index
    %c0_14 = arith.constant 0 : index
    %30 = vector.load %arg4[%c0_13, %c0_14] : memref<16x1xi32, #tpu.memory_space<vmem>>, vector<16x1xi32>
    %c65535_i32 = arith.constant 65535 : i32
    %31 = vector.broadcast %c65535_i32 : i32 to vector<16x1xi32>
    %32 = arith.andi %30, %31 : vector<16x1xi32>
    %c16_i32 = arith.constant 16 : i32
    %33 = vector.broadcast %c16_i32 : i32 to vector<16x1xi32>
    %34 = arith.shrsi %30, %33 : vector<16x1xi32>
    %35 = tpu.iota {dimensions = array<i32: 1>} : vector<16x128xi32>
    %c9_i32 = arith.constant 9 : i32
    %36 = vector.broadcast %c9_i32 : i32 to vector<16x128xi32>
    %37 = arith.cmpi slt, %35, %36 : vector<16x128xi32>
    %cst_15 = arith.constant -1.000000e+30 : f32
    %38 = vector.broadcast %cst_15 : f32 to vector<16x128xf32>
    %39 = arith.select %37, %27, %38 : vector<16x128xi1>, vector<16x128xf32>
    %cst_16 = arith.constant dense<0xFF800000> : vector<16xf32>
    %40 = vector.multi_reduction <maximumf>, %39, %cst_16 [1] : vector<16x128xf32> to vector<16xf32>
    %41 = vector.shape_cast %40 : vector<16xf32> to vector<16x1xf32>
    %42 = vector.broadcast %41 : vector<16x1xf32> to vector<16x128xf32>
    %43 = arith.subf %39, %42 : vector<16x128xf32>
    %44 = math.exp %43 : vector<16x128xf32>
    %cst_17 = arith.constant 0.000000e+00 : f32
    %45 = vector.broadcast %cst_17 : f32 to vector<16x128xf32>
    %46 = arith.select %37, %44, %45 : vector<16x128xi1>, vector<16x128xf32>
    %cst_18 = arith.constant dense<0.000000e+00> : vector<16xf32>
    %47 = vector.multi_reduction <add>, %46, %cst_18 [1] : vector<16x128xf32> to vector<16xf32>
    %48 = vector.shape_cast %47 : vector<16xf32> to vector<16x1xf32>
    %49 = math.log %48 : vector<16x1xf32>
    %50 = arith.addf %41, %49 : vector<16x1xf32>
    %51 = vector.broadcast %32 : vector<16x1xi32> to vector<16x128xi32>
    %52 = arith.cmpi eq, %35, %51 : vector<16x128xi32>
    %53 = arith.extui %52 : vector<16x128xi1> to vector<16x128xi32>
    %54 = arith.sitofp %53 : vector<16x128xi32> to vector<16x128xf32>
    %55 = arith.mulf %27, %54 : vector<16x128xf32>
    %cst_19 = arith.constant dense<0.000000e+00> : vector<16xf32>
    %56 = vector.multi_reduction <add>, %55, %cst_19 [1] : vector<16x128xf32> to vector<16xf32>
    %57 = vector.shape_cast %56 : vector<16xf32> to vector<16x1xf32>
    %58 = arith.subf %50, %57 : vector<16x1xf32>
    %c1_i32 = arith.constant 1 : i32
    %59 = vector.broadcast %c1_i32 : i32 to vector<16x1xi32>
    %60 = arith.cmpi eq, %34, %59 : vector<16x1xi32>
    %c0_i32 = arith.constant 0 : i32
    %61 = vector.broadcast %c0_i32 : i32 to vector<16x1xi32>
    %62 = arith.cmpi ne, %32, %61 : vector<16x1xi32>
    %63 = arith.andi %60, %62 : vector<16x1xi1>
    %64 = arith.extui %63 : vector<16x1xi1> to vector<16x1xi32>
    %65 = arith.sitofp %64 : vector<16x1xi32> to vector<16x1xf32>
    %66 = arith.mulf %58, %65 : vector<16x1xf32>
    %67 = vector.shape_cast %66 : vector<16x1xf32> to vector<1x16x1xf32>
    %cst_20 = arith.constant dense<0.000000e+00> : vector<1xf32>
    %68 = vector.multi_reduction <add>, %67, %cst_20 [1, 2] : vector<1x16x1xf32> to vector<1xf32>
    %69 = vector.shape_cast %68 : vector<1xf32> to vector<1x1x1xf32>
    %70 = vector.extract %69[0, 0, 0] : f32 from vector<1x1x1xf32>
    %71 = vector.shape_cast %65 : vector<16x1xf32> to vector<1x16x1xf32>
    %cst_21 = arith.constant dense<0.000000e+00> : vector<1xf32>
    %72 = vector.multi_reduction <add>, %71, %cst_21 [1, 2] : vector<1x16x1xf32> to vector<1xf32>
    %73 = vector.shape_cast %72 : vector<1xf32> to vector<1x1x1xf32>
    %74 = vector.extract %73[0, 0, 0] : f32 from vector<1x1x1xf32>
    %75 = tpu.iota {dimensions = array<i32: 1>} : vector<8x128xi32>
    %c0_i32_22 = arith.constant 0 : i32
    %76 = vector.broadcast %c0_i32_22 : i32 to vector<8x128xi32>
    %77 = arith.cmpi eq, %75, %76 : vector<8x128xi32>
    %c1_i32_23 = arith.constant 1 : i32
    %78 = vector.broadcast %c1_i32_23 : i32 to vector<8x128xi32>
    %79 = arith.cmpi eq, %75, %78 : vector<8x128xi32>
    %cst_24 = arith.constant 0.000000e+00 : f32
    %80 = vector.broadcast %74 : f32 to vector<8x128xf32>
    %81 = vector.broadcast %cst_24 : f32 to vector<8x128xf32>
    %82 = arith.select %79, %80, %81 : vector<8x128xi1>, vector<8x128xf32>
    %83 = vector.broadcast %70 : f32 to vector<8x128xf32>
    %84 = arith.select %77, %83, %82 : vector<8x128xi1>, vector<8x128xf32>
    %c0_25 = arith.constant 0 : index
    %c0_26 = arith.constant 0 : index
    %85 = vector.load %arg6[%c0_25, %c0_26] : memref<8x128xf32, #tpu.memory_space<vmem>>, vector<8x128xf32>
    tpu.vector_store %arg6[%c0_25, %c0_26], %84 {strides = array<i32>} : memref<8x128xf32, #tpu.memory_space<vmem>>, vector<8x128xf32>,
    return
  }
  func.func @transform_0(%arg0: i32) -> (i32, i32) {
    %c0_i32 = arith.constant 0 : i32
    %c0_i32_0 = arith.constant 0 : i32
    return %arg0, %c0_i32 : i32, i32
  }
  func.func @transform_1(%arg0: i32) -> (i32, i32) {
    %c0_i32 = arith.constant 0 : i32
    %c0_i32_0 = arith.constant 0 : i32
    %c0_i32_1 = arith.constant 0 : i32
    return %c0_i32, %c0_i32_0 : i32, i32
  }
  func.func @transform_2(%arg0: i32) -> (i32, i32) {
    %c0_i32 = arith.constant 0 : i32
    %c0_i32_0 = arith.constant 0 : i32
    %c0_i32_1 = arith.constant 0 : i32
    return %c0_i32, %c0_i32_0 : i32, i32
  }
  func.func @transform_3(%arg0: i32) -> (i32, i32) {
    %c0_i32 = arith.constant 0 : i32
    %c0_i32_0 = arith.constant 0 : i32
    return %arg0, %c0_i32 : i32, i32
  }
  func.func @transform_4(%arg0: i32) -> (i32, i32) {
    %c0_i32 = arith.constant 0 : i32
    %c0_i32_0 = arith.constant 0 : i32
    return %arg0, %c0_i32 : i32, i32
  }
  func.func @transform_5(%arg0: i32) -> (i32, i32) {
    %c0_i32 = arith.constant 0 : i32
    %c0_i32_0 = arith.constant 0 : i32
    return %arg0, %c0_i32 : i32, i32
  }
}

</mosaic_0001>

<bundles_post_ra>
// kernel: bert_softmax_for_ner_forward.1
= control target key start
LH: loop header
LB: loop body
LE: loop exit
PB: predicated region body
PF: predicated region fallthrough
CT: control target
= control target key end

     0   :  { %11 = vsyncpa [#allocation3], 0  ;;  %s693_s0 = inlined_call_operand.hbm [shape: bf16[16,32], index: 0, kind: input, shape index: {}]   ;;  %s694_s1 = inlined_call_operand.hbm [shape: bf16[32,128], index: 1, kind: input, shape index: {}]   ;;  %s695_s2 = inlined_call_operand.hbm [shape: f32[1,128], index: 2, kind: input, shape index: {}]   ;;  %s696_s3 = inlined_call_operand.hbm [shape: s32[16,1], index: 3, kind: input, shape index: {}]   ;;  %s697_s4 = inlined_call_operand.hbm [shape: bf16[16,128], index: 4, kind: output, shape index: {0}]   ;;  %s698_s5 = inlined_call_operand.hbm [shape: f32[8,128], index: 5, kind: output, shape index: {1}]  }
   0x1   :  { %12 = vsyncpa [#allocation6], 0 }
   0x2   :  { %13 = vsyncpa [#allocation9], 0 }
   0x3   :  { %14 = vsyncpa [#allocation4], 0 }
   0x4   :  { %15 = vsyncpa [#allocation12], 0  ;;  %s528_s18 = smov [#allocation5]   ;;  %s529_s20 = smov [#allocation2]  }
   0x5   :  { %s33_s19 = sshll.u32 %s528_s18, 4  ;;  %s21_s21 = sshll.u32 %s529_s20, 4  ;;  %s34_s19 = int_to_ptr.vmem [resolvable:$true] %s33_s19  ;;  %s571_s21 = int_to_ptr.vmem [resolvable:$true] %s21_s21 }
   0x6   :  { %s386_s24 = scalar_lea.hbm %s694_s1, 256 }
   0x7   :  { %p387_p0 = scmp.ne.s32.totalorder %s694_s1, %s386_s24  ;;  %p390_p1 = scmp.lt.u32.totalorder %s386_s24, %s694_s1 }
   0x9   :  { %p392_p2 = pnand %p390_p1, %p387_p0 }
   0xb   :  { %395 = shalt.err (!%p392_p2)
}
   0xc   :  { %s396_s29 = scalar_lea.vmem %s34_s19, 256  ;;  %p401_p4 = scmp.lt.s32.totalorder %s34_s19, %s34_s19 }
   0xd   :  { %p397_p3 = scmp.ne.s32.totalorder %s34_s19, %s396_s29  ;;  %p402_p5 = scmp.lt.s32.totalorder %s396_s29, %s396_s29 }
   0xf   :  { %p403_p6 = por %p402_p5, %p401_p4 }
  0x11   :  { %p404_p7 = pnand %p403_p6, %p397_p3 }
  0x13   :  { %407 = shalt.err (!%p404_p7)
}
  0x14   :  { %s530_s30 = smov 64   ;;  %s531_s6 = smov 4  }
  0x15   :  { %39 = dma.hbm_to_vmem [thread:$0]  %s694_s1, 256, %s34_s19, [#allocation6], %s530_s30, %s530_s30, %s531_s6  }
  0x16   :  { %s408_s11 = scalar_lea.hbm %s693_s0, 128 }
  0x17   :  { %p409_p8 = scmp.ne.s32.totalorder %s693_s0, %s408_s11  ;;  %p412_p9 = scmp.lt.u32.totalorder %s408_s11, %s693_s0 }
  0x19   :  { %p414_p10 = pnand %p412_p9, %p409_p8 }
  0x1b   :  { %417 = shalt.err (!%p414_p10)
}
  0x1c   :  { %s418_s16 = scalar_lea.vmem %s571_s21, 128  ;;  %p423_p12 = scmp.lt.s32.totalorder %s571_s21, %s571_s21 }
  0x1d   :  { %p419_p11 = scmp.ne.s32.totalorder %s571_s21, %s418_s16  ;;  %p424_p13 = scmp.lt.s32.totalorder %s418_s16, %s418_s16 }
  0x1f   :  { %p425_p0 = por %p424_p13, %p423_p12 }
  0x21   :  { %p426_p1 = pnand %p425_p0, %p419_p11 }
  0x23   :  { %429 = shalt.err (!%p426_p1)
}
  0x24   :  { %27 = dma.hbm_to_vmem [thread:$0]  %s693_s0, 128, %s571_s21, [#allocation3], %s530_s30, %s530_s30, %s531_s6  }
  0x25   :  { %s532_s18 = smov [#allocation7]   ;;  %s533_s20 = smov [#allocation8]  }
  0x26   :  { %s46_s19 = sshll.u32 %s532_s18, 4  ;;  %s55_s22 = sshll.u32 %s533_s20, 4  ;;  %s47_s19 = int_to_ptr.vmem [resolvable:$true] %s46_s19  ;;  %s608_s22 = int_to_ptr.vmem [resolvable:$true] %s55_s22 }
  0x27   :  { %s430_s25 = scalar_lea.hbm %s695_s2, 16 }
  0x28   :  { %p431_p2 = scmp.ne.s32.totalorder %s695_s2, %s430_s25  ;;  %p434_p3 = scmp.lt.u32.totalorder %s430_s25, %s695_s2 }
  0x2a   :  { %p436_p4 = pnand %p434_p3, %p431_p2 }
  0x2c   :  { %439 = shalt.err (!%p436_p4)
}
  0x2d   :  { %s440_s0 = scalar_lea.vmem %s47_s19, 16  ;;  %s444_s21 = scalar_lea.vmem %s47_s19, 32 }
  0x2e   :  { %p441_p5 = scmp.ne.s32.totalorder %s47_s19, %s440_s0  ;;  %p445_p6 = scmp.lt.s32.totalorder %s47_s19, %s47_s19 }
  0x2f   :  { %p446_p7 = scmp.lt.s32.totalorder %s444_s21, %s440_s0 }
  0x31   :  { %p447_p8 = por %p446_p7, %p445_p6 }
  0x33   :  { %p448_p9 = pnand %p447_p8, %p441_p5 }
  0x35   :  { %451 = shalt.err (!%p448_p9)
}
  0x36   :  { %49 = dma.hbm_to_vmem [thread:$0]  %s695_s2, 16, %s47_s19, [#allocation6]  }
  0x37   :  { %s452_s11 = scalar_lea.hbm %s696_s3, 256 }
  0x38   :  { %p453_p10 = scmp.ne.s32.totalorder %s696_s3, %s452_s11  ;;  %p456_p11 = scmp.lt.u32.totalorder %s452_s11, %s696_s3 }
  0x3a   :  { %p458_p12 = pnand %p456_p11, %p453_p10 }
  0x3c   :  { %461 = shalt.err (!%p458_p12)
}
  0x3d   :  { %s462_s16 = scalar_lea.vmem %s608_s22, 256  ;;  %p467_p0 = scmp.lt.s32.totalorder %s608_s22, %s608_s22 }
  0x3e   :  { %p463_p13 = scmp.ne.s32.totalorder %s608_s22, %s462_s16  ;;  %p468_p1 = scmp.lt.s32.totalorder %s462_s16, %s462_s16 }
  0x40   :  { %p469_p2 = por %p468_p1, %p467_p0 }
  0x42   :  { %p470_p3 = pnand %p469_p2, %p463_p13 }
  0x44   :  { %473 = shalt.err (!%p470_p3)
}
  0x45   :  { %s534_s2 = smov 128   ;;  %s535_s1 = smov 8  }
  0x46   :  { %61 = dma.hbm_to_vmem [thread:$0]  %s696_s3, 256, %s608_s22, [#allocation9], %s534_s2, %s534_s2, %s535_s1  }
  0x47   :  { %518 = dma.done.wait [#allocation3], 128  }
  0x48   :  { %519 = vsyncadd [#allocation3], 4294967168 }
  0x49   :  { %520 = dma.done.wait [#allocation6], 272  }
  0x4a   :  { %521 = vsyncadd [#allocation6], 4294967024 }
  0x4b   :  { %522 = dma.done.wait [#allocation9], 256  }
  0x4c   :  { %523 = vsyncadd [#allocation9], 4294967040  ;;  %v334_v0 = vld [vmem:[#allocation2] sm:$0xff]   ;;  %vm79_vm0 = vcmask 261120   ;;  %v372_v9 = vld [vmem:[#allocation5] sm:$0xff]   ;;  %v536_v10 = vmov 0.0   ;;  %v197_v36 = vlaneseq }
  0x4d   :  { %v335_v1 = vunpack.c.l.bf16 %v334_v0  ;;  %v336_v2 = vunpack.c.h.bf16 %v334_v0  ;;  %345 = vmatprep.subr.bf16.mxu0 %v536_v10  ;;  %vm537_vm1 = vmmov 0   ;;  %v373_v11 = vld [vmem:[#allocation5 + $0x8] sm:$0xff]   ;;  %v538_v35 = vmov 0   ;;  %v321_v38 = vld [vmem:[#allocation7] ss:$0 sm:$0xff]  ;;  %v192_v48 = vld [vmem:[#allocation8 + $0x8] sm:$0xff] }
  0x4e   :  { %349 = vmatprep.mubr.msk.bf16.mxu0 %vm537_vm1, %v536_v10  ;;  %346 = vmatpush3.bf16.msra.mxu0 %v372_v9  ;;  %v647_v37 = vand.u32 127, %v197_v36  ;;  %v194_v49 = vand.u32 65535, %v192_v48  ;;  %v191_v50 = vld [vmem:[#allocation8] sm:$0xff]  ;;  %vm256_vm11 = vcmask 7168   ;;  %s539_s3 = smov [#allocation10]  }
  0x4f   :  { %v80_v3 = vsel %vm79_vm0, %v335_v1, 0.0  ;;  %v89_v4 = vmul.f32 %v335_v1, %v335_v1  ;;  %v90_v5 = vmul.f32 %v336_v2, %v336_v2  ;;  %v83_v7 = vsel %vm79_vm0, %v336_v2, 0.0  ;;  %347 = vmatprep.subr.bf16.mxu0 %v536_v10  ;;  %371 = vset.pattern.permute.xlu1 %v538_v35  ;;  %s293_s19 = sshll.u32 %s539_s3, 4  ;;  %s294_s19 = int_to_ptr.vmem [resolvable:$true] %s293_s19 }
  0x50   :  { %81 = vadd.xlane.f32.xlu0 %v80_v3  ;;  %vm199_vm2 = vcmp.lt.s32.totalorder %v647_v37, 9  ;;  %v193_v51 = vand.u32 65535, %v191_v50  ;;  %vm247_vm8 = vcmp.ne.s32.totalorder %v194_v49, 0  ;;  %s474_s20 = scalar_lea.vmem %s294_s19, 128  ;;  %p479_p5 = scmp.lt.s32.totalorder %s294_s19, %s294_s19 }
  0x51   :  { %v91_v6 = vsel %vm79_vm0, %v89_v4, 0.0  ;;  %v94_v8 = vsel %vm79_vm0, %v90_v5, 0.0  ;;  %370 = vset.pattern.permute.xlu0 %v538_v35  ;;  %p475_p4 = scmp.ne.s32.totalorder %s294_s19, %s474_s20  ;;  %p480_p6 = scmp.lt.s32.totalorder %s474_s20, %s474_s20 }
  0x52   :  { %92 = vadd.xlane.f32.xlu1 %v91_v6  ;;  %348 = vmatpush3.bf16.msra.mxu0 %v373_v11  ;;  %v195_v6 = vshra.s32 %v191_v50, 16  ;;  %vm246_vm6 = vcmp.ne.s32.totalorder %v193_v51, 0 }
  0x53   :  { %p481_p7 = por %p480_p6, %p479_p5 }
  0x54   :  { %84 = vadd.xlane.f32.xlu0 %v83_v7  ;;  %v196_v7 = vshra.s32 %v192_v48, 16  ;;  %vm244_vm5 = vcmp.eq.s32.totalorder %v195_v6, 1 }
  0x55   :  { %vm248_vm9 = vmand %vm244_vm5, %vm246_vm6  ;;  %p482_p8 = pnand %p481_p7, %p475_p4 }
  0x56   :  { %95 = vadd.xlane.f32.xlu1 %v94_v8  ;;  %vm245_vm7 = vcmp.eq.s32.totalorder %v196_v7, 1 }
  0x57   :  { %vm249_vm10 = vmand %vm245_vm7, %vm247_vm8 }
  0xdd   :  { %v82_v12 = vpop.xlane.xlu0 %81 }
  0xde   :  { %v87_v13 = vmul.f32 0.03125, %v82_v12 }
  0xdf   :  { %v93_v14 = vpop.xlane.xlu1 %92 }
  0xe0   :  { %v99_v15 = vmul.f32 %v87_v13, %v87_v13  ;;  %v97_v16 = vmul.f32 0.03125, %v93_v14  ;;  %v105_v29 = vsub.f32 %v335_v1, %v87_v13 }
  0xe1   :  { %v85_v17 = vpop.xlane.xlu0 %84 }
  0xe2   :  { %v101_v18 = vsub.f32 %v97_v16, %v99_v15  ;;  %v88_v19 = vmul.f32 0.03125, %v85_v17  ;;  %v329_v15 = vsel %vm248_vm9, 1.0, %v536_v10 }
  0xe3   :  { %v96_v20 = vpop.xlane.xlu1 %95 }
  0xe4   :  { %v103_v21 = vmax.f32 %v101_v18, 0.0  ;;  %v100_v22 = vmul.f32 %v88_v19, %v88_v19  ;;  %v98_v23 = vmul.f32 0.03125, %v96_v20  ;;  %v106_v30 = vsub.f32 %v336_v2, %v88_v19 }
  0xe5   :  { %v330_v18 = vsel %vm249_vm10, 1.0, %v536_v10 }
  0xe6   :  { %v107_v24 = vadd.f32 1e-12, %v103_v21  ;;  %v102_v25 = vsub.f32 %v98_v23, %v100_v22 }
  0xe8   :  { %v104_v26 = vmax.f32 %v102_v25, 0.0  ;;  %374 = vrsqrt.f32 %v107_v24  ;;  %v269_v25 = vsel %vm256_vm11, %v329_v15, 0.0 }
  0xea   :  { %v108_v27 = vadd.f32 1e-12, %v104_v26  ;;  %v270_v26 = vsel %vm256_vm11, %v330_v18, 0.0 }
  0xec   :  { %376 = vrsqrt.f32 %v108_v27 }
  0xf2   :  { %v375_v28 = vpop.eup %374 }
  0xf3   :  { %v111_v32 = vmul.f32 %v375_v28, %v105_v29  ;;  %v271_v28 = vadd.f32 %v270_v26, %v269_v25 }
  0xf6   :  { %v377_v31 = vpop.eup %376 }
  0xf7   :  { %v112_v33 = vmul.f32 %v377_v31, %v106_v30 }
  0xf9   :  { %v113_v34 = vpack.c.bf16 %v112_v33, %v111_v32 }
  0xfb   :  { %350 = vmatmul.mubr.msk.bf16.vlgmr.msra.gmra.mrb[0].mxu0 %vm79_vm0, %v113_v34 }
 0x1ce   :  { %v174_v39 = vpop.f32.mrb[0].mxu0 }
 0x1cf   :  { %v175_v40 = vadd.f32 %v321_v38, %v174_v39  ;;  %v351_v41 = vpop.f32.mrb[1].mxu0 }
 0x1d0   :  { %v177_v42 = vpop.f32.mrb[2].mxu0 }
 0x1d1   :  { %v178_v43 = vadd.f32 %v321_v38, %v177_v42  ;;  %v352_v44 = vpop.f32.mrb[3].mxu0  ;;  %v200_v45 = vsel %vm199_vm2, %v175_v40, -1e+30 }
 0x1d2   :  { %202 = vmax.xlane.f32.xlu0 %v200_v45 }
 0x1d3   :  { %v201_v46 = vsel %vm199_vm2, %v178_v43, -1e+30  ;;  %v340_v47 = vpack.c.bf16 %v178_v43, %v175_v40 }
 0x1d4   :  { %204 = vmax.xlane.f32.xlu1 %v201_v46 }
 0x1d5   :  { %341 = vst [vmem:[#allocation10] sm:$0xff] %v340_v47  }
 0x1e5   :  { %228 = vperm.xlu1 %371, %v194_v49  }
 0x1e8   :  { %225 = vperm.xlu0 %370, %v193_v51  }
 0x25f   :  { %v203_v52 = vpop.xlane.xlu0 %202 }
 0x260   :  { %v206_v53 = vsub.f32 %v200_v45, %v203_v52 }
 0x261   :  { %v205_v54 = vpop.xlane.xlu1 %204 }
 0x262   :  { %v208_v55 = vmul.f32 1.442695, %v206_v53  ;;  %v207_v56 = vsub.f32 %v201_v46, %v205_v54 }
 0x264   :  { %378 = vpow2.f32 %v208_v55  ;;  %v210_v57 = vmul.f32 1.442695, %v207_v56 }
 0x265   :  { %v229_v59 = vpop.permute.xlu1 %228 }
 0x266   :  { %380 = vpow2.f32 %v210_v57  ;;  %vm231_vm4 = vcmp.eq.s32.totalorder %v647_v37, %v229_v59 }
 0x267   :  { %v226_v58 = vpop.permute.xlu0 %225  ;;  %v328_v2 = vsel %vm231_vm4, 1.0, %v536_v10 }
 0x268   :  { %vm230_vm3 = vcmp.eq.s32.totalorder %v647_v37, %v226_v58  ;;  %v237_v3 = vmul.f32 %v328_v2, %v178_v43 }
 0x269   :  { %v327_v61 = vsel %vm230_vm3, 1.0, %v536_v10 }
 0x26a   :  { %v236_v1 = vmul.f32 %v327_v61, %v175_v40 }
 0x26e   :  { %v379_v60 = vpop.eup %378 }
 0x26f   :  { %v212_v62 = vsel %vm199_vm2, %v379_v60, 0.0 }
 0x270   :  { %v381_v63 = vpop.eup %380  ;;  %214 = vadd.xlane.f32.xlu1 %v212_v62 }
 0x271   :  { %v213_v0 = vsel %vm199_vm2, %v381_v63, 0.0 }
 0x272   :  { %216 = vadd.xlane.f32.xlu0 %v213_v0 }
 0x274   :  { %238 = vadd.xlane.f32.xlu1 %v236_v1 }
 0x278   :  { %240 = vadd.xlane.f32.xlu1 %v237_v3 }
 0x2fd   :  { %v215_v4 = vpop.xlane.xlu1 %214 }
 0x2fe   :  { %382 = vlog2.f32 %v215_v4 }
 0x2ff   :  { %v217_v5 = vpop.xlane.xlu0 %216 }
 0x300   :  { %384 = vlog2.f32 %v217_v5 }
 0x301   :  { %v239_v9 = vpop.xlane.xlu1 %238 }
 0x305   :  { %v241_v19 = vpop.xlane.xlu1 %240 }
 0x308   :  { %v383_v8 = vpop.eup %382 }
 0x309   :  { %v219_v11 = vmul.f32 0.6931472, %v383_v8 }
 0x30a   :  { %v385_v12 = vpop.eup %384 }
 0x30b   :  { %v221_v13 = vmul.f32 0.6931472, %v385_v12  ;;  %v222_v14 = vadd.f32 %v219_v11, %v203_v52 }
 0x30d   :  { %v242_v16 = vsub.f32 %v222_v14, %v239_v9  ;;  %v223_v17 = vadd.f32 %v221_v13, %v205_v54 }
 0x30f   :  { %v254_v20 = vmul.f32 %v329_v15, %v242_v16  ;;  %v243_v21 = vsub.f32 %v223_v17, %v241_v19 }
 0x311   :  { %v255_v22 = vmul.f32 %v330_v18, %v243_v21  ;;  %v257_v23 = vsel %vm256_vm11, %v254_v20, 0.0 }
 0x313   :  { %v258_v24 = vsel %vm256_vm11, %v255_v22, 0.0 }
 0x314   :  { %v259_v27 = vadd.f32 %v258_v24, %v257_v23 }
 0x316   :  { %260 = vadd.xlane.f32.xlu1 %v259_v27 }
 0x31a   :  { %272 = vadd.xlane.f32.xlu1 %v271_v28 }
 0x31b   :  { %485 = shalt.err (!%p482_p8)
}
 0x31c   :  { %s486_s24 = scalar_lea.hbm %s697_s4, 128 }
 0x31d   :  { %p487_p9 = scmp.ne.s32.totalorder %s697_s4, %s486_s24  ;;  %p490_p10 = scmp.lt.u32.totalorder %s486_s24, %s697_s4 }
 0x31f   :  { %p492_p11 = pnand %p490_p10, %p487_p9 }
 0x321   :  { %495 = shalt.err (!%p492_p11)
}
 0x322   :  { %299 = dma.vmem_to_hbm [thread:$0]  %s294_s19, 128, %s697_s4, [#allocation4], %s530_s30, %s530_s30, %s531_s6   ;;  %vm282_vm12 = vcmp.eq.s32.totalorder %v647_v37, 1  ;;  %vm281_vm13 = vcmp.eq.s32.totalorder %v647_v37, 0 }
 0x323   :  { %s540_s4 = smov [#allocation11]  }
 0x324   :  { %s306_s30 = sshll.u32 %s540_s4, 4  ;;  %s307_s30 = int_to_ptr.vmem [resolvable:$true] %s306_s30 }
 0x325   :  { %s496_s7 = scalar_lea.vmem %s307_s30, 128  ;;  %p501_p13 = scmp.lt.s32.totalorder %s307_s30, %s307_s30 }
 0x326   :  { %p497_p12 = scmp.ne.s32.totalorder %s307_s30, %s496_s7  ;;  %p502_p0 = scmp.lt.s32.totalorder %s496_s7, %s496_s7 }
 0x328   :  { %p503_p1 = por %p502_p0, %p501_p13 }
 0x32a   :  { %p504_p2 = pnand %p503_p1, %p497_p12 }
 0x3a3   :  { %v261_v10 = vpop.xlane.xlu1 %260 }
 0x3a4   :  { %v262_v29 = vrot.slane %v261_v10, 4 }
 0x3a6   :  { %v263_v30 = vadd.f32 %v262_v29, %v261_v10 }
 0x3a7   :  { %v273_v31 = vpop.xlane.xlu1 %272 }
 0x3a8   :  { %v264_v32 = vrot.slane %v263_v30, 2  ;;  %v274_v33 = vrot.slane %v273_v31, 4 }
 0x3aa   :  { %v275_v34 = vadd.f32 %v274_v33, %v273_v31  ;;  %v265_v35 = vadd.f32 %v264_v32, %v263_v30 }
 0x3ac   :  { %v276_v36 = vrot.slane %v275_v34, 2  ;;  %v266_v38 = vrot.slane %v265_v35, 1 }
 0x3ae   :  { %v277_v39 = vadd.f32 %v276_v36, %v275_v34  ;;  %v267_v40 = vadd.f32 %v266_v38, %v265_v35 }
 0x3b0   :  { %353 = vpush %v267_v40  ;;  %v278_v41 = vrot.slane %v277_v39, 1 }
 0x3b2   :  { %v279_v42 = vadd.f32 %v278_v41, %v277_v39 }
 0x3b4   :  { %355 = vpush %v279_v42 }
 0x3e1   :  { %s354_s21 = spop %353 }
 0x3e2   :  { %v285_v44 = vstv %s354_s21 }
 0x3e5   :  { %s356_s6 = spop %355 }
 0x3e6   :  { %v283_v43 = vstv %s356_s6 }
 0x3e7   :  { %v284_v45 = vsel %vm282_vm12, %v283_v43, 0.0 }
 0x3e8   :  { %v286_v46 = vsel %vm281_vm13, %v285_v44, %v284_v45 }
 0x3e9   :  { %287 = vst [vmem:[#allocation11] sm:$0xff] %v286_v46 }
 0x3ea   :  { %507 = shalt.err (!%p504_p2)
}
 0x3eb   :  { %s508_s10 = scalar_lea.hbm %s698_s5, 128 }
 0x3ec   :  { %p509_p3 = scmp.ne.s32.totalorder %s698_s5, %s508_s10  ;;  %p512_p4 = scmp.lt.u32.totalorder %s508_s10, %s698_s5 }
 0x3ee   :  { %p514_p5 = pnand %p512_p4, %p509_p3 }
 0x3f0   :  { %517 = shalt.err (!%p514_p5)
}
 0x3f1   :  { %309 = dma.vmem_to_hbm [thread:$0]  %s307_s30, 128, %s698_s5, [#allocation12]  }
 0x3f2   :  { %524 = dma.done.wait [#allocation4], 128  }
 0x3f3   :  { %525 = vsyncadd [#allocation4], 4294967168 }
 0x3f4   :  { %526 = dma.done.wait [#allocation12], 128  }
 0x3f5   :  { %527 = vsyncadd [#allocation12], 4294967168 }
 0x3f6   :  { %316 = vsyncpa [#allocation3], 1 }
 0x3f7   :  { %317 = vsyncpa [#allocation6], 1 }
 0x3f8   :  { %318 = vsyncpa [#allocation9], 1 }
 0x3f9   :  { %319 = vsyncpa [#allocation4], 1 }
 0x3fa   :  { %320 = vsyncpa [#allocation12], 1 }

</bundles_post_ra>
